<compile_context>
chip_gen: v5e
topology: v5e:2x2
jax: 0.10.0
libtpu: 0.0.40
codegen_flags: <defaults>
</compile_context>

<pallas_src>
import jax
import jax.numpy as jnp
from jax import lax
from jax.experimental import pallas as pl
from jax.experimental.pallas import tpu as pltpu

_EPS = 1e-12  # F.normalize default epsilon


def _make_time_merge_kernel(dim_out, has_res):
    def kernel(x_ref, m1_ref, shift_ref, wst_ref, bst_ref,
               w2_ref, b2_ref, g2_ref, out_ref):
        f32 = jnp.float32
        x = x_ref[0]                                            # (Cin, TN)

        # --- block1 conv (+ residual conv) stacked into one MXU launch ---
        y = jnp.dot(wst_ref[...], x,
                    precision=lax.Precision.HIGHEST,
                    preferred_element_type=f32) + bst_ref[...]  # (Cstack, TN)
        h = y[:dim_out, :]                                      # (Cout, TN)

        # --- RMSNorm: F.normalize(dim=channels) * g * sqrt(d), with the gain,
        #     sqrt(d) and (scale+1) folded into m1 (per batch, per channel) ---
        sumsq = jnp.sum(h * h, axis=0, keepdims=True)           # (1, TN)
        inv = lax.rsqrt(jnp.maximum(sumsq, f32(_EPS * _EPS)))   # EUP, ~free slot
        h = h * inv
        h = h * m1_ref[0] + shift_ref[0]                        # (Cout,1) broadcasts
        h = h * jax.nn.sigmoid(h)                               # SiLU
        # TODO(synk): nn.Dropout is identity in eval / p=0.0; training-mode
        # in-kernel dropout RNG is not implemented.

        # --- block2: Conv1d(k=1) -> RMSNorm -> SiLU (g2 pre-scaled by sqrt(d)) ---
        h = jnp.dot(w2_ref[...], h,
                    precision=lax.Precision.HIGHEST,
                    preferred_element_type=f32) + b2_ref[...]
        sumsq = jnp.sum(h * h, axis=0, keepdims=True)
        inv = lax.rsqrt(jnp.maximum(sumsq, f32(_EPS * _EPS)))
        h = (h * inv) * g2_ref[...]
        h = h * jax.nn.sigmoid(h)

        # --- residual (second half of the stacked dot, or identity) ---
        res = y[dim_out:, :] if has_res else x
        out_ref[0] = (h + res).astype(out_ref.dtype)            # lane-dense store

    return kernel


def _vmem_capacity_bytes():
    try:
        return int(pltpu.get_tpu_info().vmem_capacity_bytes)
    except Exception:
        return 64 << 20   # conservative fallback (v7x has the smallest VMEM)


def _round_up(v, m):
    return -(-v // m) * m


def _choose_tile_n(n, bs, cin, cout, dtype_bytes=4):
    """Lane-dense (multiple-of-128) tile width sized from the chip's actual
    VMEM capacity; keeps >=2 grid steps (v7x has 2 TensorCores)."""
    if n % 128 != 0:
        # block lane dim must be a multiple of 128 or equal the full dim
        return n
    io_budget = max(8 << 20, _vmem_capacity_bytes() // 3)
    # sublane padding: second-to-last dims pad up to multiples of 8 (f32)
    row_bytes = (_round_up(cin, 8) + _round_up(cout, 8)) * dtype_bytes
    max_tn = max(128, (io_budget // (2 * row_bytes)) // 128 * 128)
    tn = min(n, max_tn)
    if bs == 1 and n >= 256:
        # guarantee at least 2 grid steps so both v7x TCs get work
        tn = min(tn, max(128, (n // 2) // 128 * 128))
    return tn


def time_merge(x, time_emb, params):
    """
    x        : [bs, dim_in, n_node]   float32
    time_emb : [bs, time_emb_dim]     float32
    params   : dict with mlp_w [2*Cout,Tdim], mlp_b [2*Cout],
               w1 [Cout,Cin], b1 [Cout], g1 [Cout],
               w2 [Cout,Cout], b2 [Cout], g2 [Cout],
               and (if Cin != Cout) res_w [Cout,Cin], res_b [Cout].
    returns  : [bs, dim_out, n_node]
    """
    bs, cin, n = x.shape
    wmlp = params["mlp_w"]
    two_cout, _ = wmlp.shape
    cout = two_cout // 2
    has_res = cin != cout
    sqrt_d = float(cout) ** 0.5

    # ---- time MLP hoisted out of the kernel (depends only on batch) ----
    t = jnp.where(time_emb >= 0, time_emb, 0.2 * time_emb)      # LeakyReLU(0.2)
    te = jnp.einsum("bt,ot->bo", t, wmlp,
                    precision=lax.Precision.HIGHEST) + params["mlp_b"]
    scale = te[:, :cout]
    shift = te[:, cout:].reshape(bs, cout, 1)
    # fold RMSNorm gain, sqrt(d) and (scale+1) into one column multiplier
    m1 = ((params["g1"] * sqrt_d)[None, :] * (scale + 1.0)).reshape(bs, cout, 1)
    g2s = (params["g2"] * sqrt_d).reshape(cout, 1)
    b2 = params["b2"].reshape(cout, 1)

    # ---- stack block1 conv with the residual projection: one dot against x ----
    if has_res:
        w_stack = jnp.concatenate([params["w1"], params["res_w"]], axis=0)
        b_stack = jnp.concatenate([params["b1"], params["res_b"]],
                                  axis=0).reshape(-1, 1)
    else:
        w_stack = params["w1"]
        b_stack = params["b1"].reshape(-1, 1)
    cstack = w_stack.shape[0]

    tn = _choose_tile_n(n, bs, cin, cout)
    grid = (bs, pl.cdiv(n, tn))

    inputs = [x, m1, shift, w_stack, b_stack, params["w2"], b2, g2s]
    in_specs = [
        pl.BlockSpec((1, cin, tn), lambda b, nt: (b, 0, nt)),
        pl.BlockSpec((1, cout, 1), lambda b, nt: (b, 0, 0)),
        pl.BlockSpec((1, cout, 1), lambda b, nt: (b, 0, 0)),
        pl.BlockSpec((cstack, cin), lambda b, nt: (0, 0)),
        pl.BlockSpec((cstack, 1), lambda b, nt: (0, 0)),
        pl.BlockSpec((cout, cout), lambda b, nt: (0, 0)),
        pl.BlockSpec((cout, 1), lambda b, nt: (0, 0)),
        pl.BlockSpec((cout, 1), lambda b, nt: (0, 0)),
    ]

    out_shape = jax.ShapeDtypeStruct((bs, cout, n), x.dtype)
    out_spec = pl.BlockSpec((1, cout, tn), lambda b, nt: (b, 0, nt))

    # ---- VMEM limit from padded (8-sublane / 128-lane tiled) footprints ----
    bpe = jnp.dtype(x.dtype).itemsize
    cin_p, cout_p, cst_p = _round_up(cin, 8), _round_up(cout, 8), _round_up(cstack, 8)
    io_bytes = 2 * (cin_p + cout_p) * tn * bpe                  # double-buffered x + out
    param_bytes = 2 * bpe * (cst_p * _round_up(cin, 128)        # w_stack
                             + cout_p * _round_up(cout, 128)    # w2
                             + (cst_p + 4 * cout_p) * 128)      # b_stack, m1, shift, b2, g2s
    vmem_limit = int(min(_vmem_capacity_bytes(),
                         max(16 << 20, io_bytes + param_bytes + (4 << 20))))

    return pl.pallas_call(
        _make_time_merge_kernel(cout, has_res),
        out_shape=out_shape,
        grid_spec=pltpu.PrefetchScalarGridSpec(
            num_scalar_prefetch=0,
            grid=grid,
            in_specs=in_specs,
            out_specs=out_spec,
        ),
        compiler_params=pltpu.CompilerParams(
            dimension_semantics=("parallel", "parallel"),
            vmem_limit_bytes=vmem_limit,
        ),
    )(*inputs)


def time_merge_ref(x, time_emb, params):
    """Pure-JAX reference (mirrors the PyTorch forward in eval mode)."""
    cout = params["w1"].shape[0]
    sqrt_d = float(cout) ** 0.5

    t = jnp.where(time_emb >= 0, time_emb, 0.2 * time_emb)
    te = jnp.einsum("bt,ot->bo", t, params["mlp_w"],
                    precision=lax.Precision.HIGHEST) + params["mlp_b"]
    scale = te[:, :cout, None]
    shift = te[:, cout:, None]

    def block(h_in, w, b, g, scale_shift=None):
        h = jnp.einsum("oc,bcn->bon", w, h_in,
                       precision=lax.Precision.HIGHEST) + b[None, :, None]
        norm = jnp.sqrt(jnp.sum(h * h, axis=1, keepdims=True))
        h = h / jnp.maximum(norm, _EPS)
        h = h * g[None, :, None] * sqrt_d
        if scale_shift is not None:
            s, sh = scale_shift
            h = h * (s + 1.0) + sh
        return h * jax.nn.sigmoid(h)

    h = block(x, params["w1"], params["b1"], params["g1"], (scale, shift))
    h = block(h, params["w2"], params["b2"], params["g2"])

    if x.shape[1] != cout:
        res = jnp.einsum("oc,bcn->bon", params["res_w"], x,
                         precision=lax.Precision.HIGHEST) + params["res_b"][None, :, None]
    else:
        res = x
    return h + res


if __name__ == "__main__":
    # Small shapes consistent with the module.
    bs, dim_in, dim_out, tdim, n_node = 2, 4, 8, 32, 256

    key = jax.random.PRNGKey(0)
    ks = jax.random.split(key, 12)

    x = jax.random.normal(ks[0], (bs, dim_in, n_node), dtype=jnp.float32)
    time_emb = jax.random.normal(ks[1], (bs, tdim), dtype=jnp.float32)

    params = {
        "mlp_w": 0.2 * jax.random.normal(ks[2], (2 * dim_out, tdim), dtype=jnp.float32),
        "mlp_b": 0.1 * jax.random.normal(ks[3], (2 * dim_out,), dtype=jnp.float32),
        "w1": 0.5 * jax.random.normal(ks[4], (dim_out, dim_in), dtype=jnp.float32),
        "b1": 0.1 * jax.random.normal(ks[5], (dim_out,), dtype=jnp.float32),
        "g1": 1.0 + 0.1 * jax.random.normal(ks[6], (dim_out,), dtype=jnp.float32),
        "w2": 0.5 * jax.random.normal(ks[7], (dim_out, dim_out), dtype=jnp.float32),
        "b2": 0.1 * jax.random.normal(ks[8], (dim_out,), dtype=jnp.float32),
        "g2": 1.0 + 0.1 * jax.random.normal(ks[9], (dim_out,), dtype=jnp.float32),
        # dim_in != dim_out -> res_conv is a pointwise 1x1 channel projection.
        "res_w": 0.5 * jax.random.normal(ks[10], (dim_out, dim_in), dtype=jnp.float32),
        "res_b": 0.1 * jax.random.normal(ks[11], (dim_out,), dtype=jnp.float32),
    }

    out = time_merge(x, time_emb, params)
    out = jax.block_until_ready(out)

    ref = time_merge_ref(x, time_emb, params)
    assert out.shape == (bs, dim_out, n_node)
    assert bool(jnp.allclose(out, ref, atol=1e-4, rtol=1e-4)), (
        float(jnp.max(jnp.abs(out - ref))))

    print("KERNEL_OK")
</pallas_src>

<mosaic_0001>
module attributes {stable_mosaic.version = 11 : i64} {
  func.func @kernel(%arg0: i32, %arg1: i32, %arg2: memref<1x4x256xf32, #tpu.memory_space<vmem>>, %arg3: memref<1x8x1xf32, #tpu.memory_space<vmem>>, %arg4: memref<1x8x1xf32, #tpu.memory_space<vmem>>, %arg5: memref<16x4xf32, #tpu.memory_space<vmem>>, %arg6: memref<16x1xf32, #tpu.memory_space<vmem>>, %arg7: memref<8x8xf32, #tpu.memory_space<vmem>>, %arg8: memref<8x1xf32, #tpu.memory_space<vmem>>, %arg9: memref<8x1xf32, #tpu.memory_space<vmem>>, %arg10: memref<1x8x256xf32, #tpu.memory_space<vmem>>) attributes {dimension_semantics = [#tpu.dimension_semantics<parallel>, #tpu.dimension_semantics<parallel>], iteration_bounds = array<i64: 2, 1>, scalar_prefetch = 0 : i64, scratch_operands = 0 : i64, tpu.core_type = #tpu.core_type<tc>, window_params = [{transform_indices = @transform_0, window_bounds = array<i64: 1, 4, 256>}, {transform_indices = @transform_1, window_bounds = array<i64: 1, 8, 1>}, {transform_indices = @transform_2, window_bounds = array<i64: 1, 8, 1>}, {pipeline_mode = #tpu.pipeline_mode<synchronous>, transform_indices = @transform_3, window_bounds = array<i64: 16, 4>}, {pipeline_mode = #tpu.pipeline_mode<synchronous>, transform_indices = @transform_4, window_bounds = array<i64: 16, 1>}, {pipeline_mode = #tpu.pipeline_mode<synchronous>, transform_indices = @transform_5, window_bounds = array<i64: 8, 8>}, {pipeline_mode = #tpu.pipeline_mode<synchronous>, transform_indices = @transform_6, window_bounds = array<i64: 8, 1>}, {pipeline_mode = #tpu.pipeline_mode<synchronous>, transform_indices = @transform_7, window_bounds = array<i64: 8, 1>}, {transform_indices = @transform_8, window_bounds = array<i64: 1, 8, 256>}]} {
    %c0 = arith.constant 0 : index
    %c0_0 = arith.constant 0 : index
    %c0_1 = arith.constant 0 : index
    %0 = vector.load %arg2[%c0, %c0_0, %c0_1] : memref<1x4x256xf32, #tpu.memory_space<vmem>>, vector<1x4x256xf32>
    %1 = vector.shape_cast %0 : vector<1x4x256xf32> to vector<4x256xf32>
    %c0_2 = arith.constant 0 : index
    %c0_3 = arith.constant 0 : index
    %2 = vector.load %arg5[%c0_2, %c0_3] : memref<16x4xf32, #tpu.memory_space<vmem>>, vector<16x4xf32>
    %cst = arith.constant dense<0.000000e+00> : vector<16x256xf32>
    %3 = tpu.matmul %2, %1, %cst {dimension_numbers = #tpu.dot_dimension_numbers<[1], [0], [0], [1], [0, 0, 1, 1], [], []>, precision = #tpu.contract_precision<fp32>} : vector<16x4xf32>, vector<4x256xf32>, vector<16x256xf32> -> vector<16x256xf32>
    %c0_4 = arith.constant 0 : index
    %c0_5 = arith.constant 0 : index
    %4 = vector.load %arg6[%c0_4, %c0_5] : memref<16x1xf32, #tpu.memory_space<vmem>>, vector<16x1xf32>
    %5 = vector.broadcast %4 : vector<16x1xf32> to vector<16x256xf32>
    %6 = arith.addf %3, %5 : vector<16x256xf32>
    %7 = vector.extract_strided_slice %6 {offsets = [0, 0], sizes = [8, 256], strides = [1, 1]} : vector<16x256xf32> to vector<8x256xf32>
    %8 = arith.mulf %7, %7 : vector<8x256xf32>
    %cst_6 = arith.constant dense<0.000000e+00> : vector<256xf32>
    %9 = vector.multi_reduction <add>, %8, %cst_6 [0] : vector<8x256xf32> to vector<256xf32>
    %10 = vector.shape_cast %9 : vector<256xf32> to vector<1x256xf32>
    %cst_7 = arith.constant 1.000000e-24 : f32
    %11 = vector.broadcast %cst_7 : f32 to vector<1x256xf32>
    %12 = arith.maximumf %10, %11 : vector<1x256xf32>
    %13 = math.rsqrt %12 : vector<1x256xf32>
    %14 = vector.broadcast %13 : vector<1x256xf32> to vector<8x256xf32>
    %15 = arith.mulf %7, %14 : vector<8x256xf32>
    %c0_8 = arith.constant 0 : index
    %c0_9 = arith.constant 0 : index
    %c0_10 = arith.constant 0 : index
    %16 = vector.load %arg3[%c0_8, %c0_9, %c0_10] : memref<1x8x1xf32, #tpu.memory_space<vmem>>, vector<1x8x1xf32>
    %17 = vector.shape_cast %16 : vector<1x8x1xf32> to vector<8x1xf32>
    %18 = vector.broadcast %17 : vector<8x1xf32> to vector<8x256xf32>
    %19 = arith.mulf %15, %18 : vector<8x256xf32>
    %c0_11 = arith.constant 0 : index
    %c0_12 = arith.constant 0 : index
    %c0_13 = arith.constant 0 : index
    %20 = vector.load %arg4[%c0_11, %c0_12, %c0_13] : memref<1x8x1xf32, #tpu.memory_space<vmem>>, vector<1x8x1xf32>
    %21 = vector.shape_cast %20 : vector<1x8x1xf32> to vector<8x1xf32>
    %22 = vector.broadcast %21 : vector<8x1xf32> to vector<8x256xf32>
    %23 = arith.addf %19, %22 : vector<8x256xf32>
    %24 = arith.negf %23 : vector<8x256xf32>
    %25 = math.exp %24 : vector<8x256xf32>
    %cst_14 = arith.constant 1.000000e+00 : f32
    %26 = vector.broadcast %cst_14 : f32 to vector<8x256xf32>
    %27 = arith.addf %26, %25 : vector<8x256xf32>
    %28 = arith.divf %26, %27 : vector<8x256xf32>
    %29 = arith.mulf %23, %28 : vector<8x256xf32>
    %c0_15 = arith.constant 0 : index
    %c0_16 = arith.constant 0 : index
    %30 = vector.load %arg7[%c0_15, %c0_16] : memref<8x8xf32, #tpu.memory_space<vmem>>, vector<8x8xf32>
    %cst_17 = arith.constant dense<0.000000e+00> : vector<8x256xf32>
    %31 = tpu.matmul %30, %29, %cst_17 {dimension_numbers = #tpu.dot_dimension_numbers<[1], [0], [0], [1], [0, 0, 1, 1], [], []>, precision = #tpu.contract_precision<fp32>} : vector<8x8xf32>, vector<8x256xf32>, vector<8x256xf32> -> vector<8x256xf32>
    %c0_18 = arith.constant 0 : index
    %c0_19 = arith.constant 0 : index
    %32 = vector.load %arg8[%c0_18, %c0_19] : memref<8x1xf32, #tpu.memory_space<vmem>>, vector<8x1xf32>
    %33 = vector.broadcast %32 : vector<8x1xf32> to vector<8x256xf32>
    %34 = arith.addf %31, %33 : vector<8x256xf32>
    %35 = arith.mulf %34, %34 : vector<8x256xf32>
    %cst_20 = arith.constant dense<0.000000e+00> : vector<256xf32>
    %36 = vector.multi_reduction <add>, %35, %cst_20 [0] : vector<8x256xf32> to vector<256xf32>
    %37 = vector.shape_cast %36 : vector<256xf32> to vector<1x256xf32>
    %cst_21 = arith.constant 1.000000e-24 : f32
    %38 = vector.broadcast %cst_21 : f32 to vector<1x256xf32>
    %39 = arith.maximumf %37, %38 : vector<1x256xf32>
    %40 = math.rsqrt %39 : vector<1x256xf32>
    %41 = vector.broadcast %40 : vector<1x256xf32> to vector<8x256xf32>
    %42 = arith.mulf %34, %41 : vector<8x256xf32>
    %c0_22 = arith.constant 0 : index
    %c0_23 = arith.constant 0 : index
    %43 = vector.load %arg9[%c0_22, %c0_23] : memref<8x1xf32, #tpu.memory_space<vmem>>, vector<8x1xf32>
    %44 = vector.broadcast %43 : vector<8x1xf32> to vector<8x256xf32>
    %45 = arith.mulf %42, %44 : vector<8x256xf32>
    %46 = arith.negf %45 : vector<8x256xf32>
    %47 = math.exp %46 : vector<8x256xf32>
    %cst_24 = arith.constant 1.000000e+00 : f32
    %48 = vector.broadcast %cst_24 : f32 to vector<8x256xf32>
    %49 = arith.addf %48, %47 : vector<8x256xf32>
    %50 = arith.divf %48, %49 : vector<8x256xf32>
    %51 = arith.mulf %45, %50 : vector<8x256xf32>
    %52 = vector.extract_strided_slice %6 {offsets = [8, 0], sizes = [8, 256], strides = [1, 1]} : vector<16x256xf32> to vector<8x256xf32>
    %53 = arith.addf %51, %52 : vector<8x256xf32>
    %c0_25 = arith.constant 0 : index
    %c0_26 = arith.constant 0 : index
    %c0_27 = arith.constant 0 : index
    %54 = vector.load %arg10[%c0_25, %c0_26, %c0_27] : memref<1x8x256xf32, #tpu.memory_space<vmem>>, vector<1x8x256xf32>
    %55 = vector.shape_cast %54 : vector<1x8x256xf32> to vector<8x256xf32>
    %56 = vector.shape_cast %53 : vector<8x256xf32> to vector<1x8x256xf32>
    tpu.vector_store %arg10[%c0_25, %c0_26, %c0_27], %56 {strides = array<i32>} : memref<1x8x256xf32, #tpu.memory_space<vmem>>, vector<1x8x256xf32>,
    return
  }
  func.func @transform_0(%arg0: i32, %arg1: i32) -> (i32, i32, i32) {
    %c0_i32 = arith.constant 0 : i32
    %c0_i32_0 = arith.constant 0 : i32
    return %arg0, %c0_i32, %arg1 : i32, i32, i32
  }
  func.func @transform_1(%arg0: i32, %arg1: i32) -> (i32, i32, i32) {
    %c0_i32 = arith.constant 0 : i32
    %c0_i32_0 = arith.constant 0 : i32
    %c0_i32_1 = arith.constant 0 : i32
    return %arg0, %c0_i32, %c0_i32_0 : i32, i32, i32
  }
  func.func @transform_2(%arg0: i32, %arg1: i32) -> (i32, i32, i32) {
    %c0_i32 = arith.constant 0 : i32
    %c0_i32_0 = arith.constant 0 : i32
    %c0_i32_1 = arith.constant 0 : i32
    return %arg0, %c0_i32, %c0_i32_0 : i32, i32, i32
  }
  func.func @transform_3(%arg0: i32, %arg1: i32) -> (i32, i32) {
    %c0_i32 = arith.constant 0 : i32
    %c0_i32_0 = arith.constant 0 : i32
    %c0_i32_1 = arith.constant 0 : i32
    return %c0_i32, %c0_i32_0 : i32, i32
  }
  func.func @transform_4(%arg0: i32, %arg1: i32) -> (i32, i32) {
    %c0_i32 = arith.constant 0 : i32
    %c0_i32_0 = arith.constant 0 : i32
    %c0_i32_1 = arith.constant 0 : i32
    return %c0_i32, %c0_i32_0 : i32, i32
  }
  func.func @transform_5(%arg0: i32, %arg1: i32) -> (i32, i32) {
    %c0_i32 = arith.constant 0 : i32
    %c0_i32_0 = arith.constant 0 : i32
    %c0_i32_1 = arith.constant 0 : i32
    return %c0_i32, %c0_i32_0 : i32, i32
  }
  func.func @transform_6(%arg0: i32, %arg1: i32) -> (i32, i32) {
    %c0_i32 = arith.constant 0 : i32
    %c0_i32_0 = arith.constant 0 : i32
    %c0_i32_1 = arith.constant 0 : i32
    return %c0_i32, %c0_i32_0 : i32, i32
  }
  func.func @transform_7(%arg0: i32, %arg1: i32) -> (i32, i32) {
    %c0_i32 = arith.constant 0 : i32
    %c0_i32_0 = arith.constant 0 : i32
    %c0_i32_1 = arith.constant 0 : i32
    return %c0_i32, %c0_i32_0 : i32, i32
  }
  func.func @transform_8(%arg0: i32, %arg1: i32) -> (i32, i32, i32) {
    %c0_i32 = arith.constant 0 : i32
    %c0_i32_0 = arith.constant 0 : i32
    return %arg0, %c0_i32, %arg1 : i32, i32, i32
  }
}

</mosaic_0001>

<bundles_post_ra>
// kernel: tpu_custom_call.1
= control target key start
LH: loop header
LB: loop body
LE: loop exit
PB: predicated region body
PF: predicated region fallthrough
CT: control target
= control target key end

     0   :  { %13 = vsyncpa [#allocation3], 0  ;;  %s1788_s0 = inlined_call_operand.vmem [shape: f32[2,4,256], index: 0, kind: input, shape index: {}]   ;;  %s1789_s1 = inlined_call_operand.vmem [shape: f32[2,8,1], index: 1, kind: input, shape index: {}]   ;;  %s1790_s2 = inlined_call_operand.vmem [shape: f32[2,8,1], index: 2, kind: input, shape index: {}]   ;;  %s1791_s3 = inlined_call_operand.vmem [shape: f32[16,4], index: 3, kind: input, shape index: {}]   ;;  %s1792_s4 = inlined_call_operand.vmem [shape: f32[16,1], index: 4, kind: input, shape index: {}]   ;;  %s1793_s5 = inlined_call_operand.vmem [shape: f32[8,8], index: 5, kind: input, shape index: {}]   ;;  %s1794_s6 = inlined_call_operand.vmem [shape: f32[8,1], index: 6, kind: input, shape index: {}]   ;;  %s1795_s7 = inlined_call_operand.vmem [shape: f32[8,1], index: 7, kind: input, shape index: {}]   ;;  %s1796_s8 = inlined_call_operand.hbm [shape: f32[2,8,256], index: 8, kind: output, shape index: {}]  }
   0x1   :  { %15 = vsyncpa [#allocation3 + $0x1], 0  ;;  %s1590_s27 = smov 0   ;;  %s1592_s28 = smov 0  }
   0x2   :  { %s1594_s29 = smov 0   ;;  %s1596_s30 = smov 0  }
   0x3   :  { %s1598_s9 = smov 0   ;;  %s1600_s10 = smov 0  }
   0x4 LB: > { %s1360_s11 = sadd.s32 4294967295, %s1542_s10   ;;  %s1361_s12 = sadd.s32 4294967294, %s1542_s10   ;;  %s1542_s10 = sphi %s1600_s10, %s21_s10   ;;  %s1538_s9 = sphi %s1598_s9, %s1803_s9   ;;  %s1534_s30 = sphi %s1596_s30, %s1802_s30   ;;  %s1530_s29 = sphi %s1594_s29, %s1801_s29   ;;  %s1526_s28 = sphi %s1592_s28, %s1800_s28   ;;  %s1522_s27 = sphi %s1590_s27, %s1799_s27  }
   0x5   : > { %s33_s13 = sadd.s32 1, %s1538_s9  ;;  %s227_s14 = sadd.s32 1, %s1530_s29 }
   0x6   : > { %p35_p0 = scmp.ge.s32.totalorder %s33_s13, 2  ;;  %p237_p1 = scmp.ne.s32.totalorder %s1530_s29, %s1526_s28 }
   0x7   : > { %p238_p2 = scmp.eq.s32.totalorder %s1360_s11, 1  ;;  %p243_p3 = scmp.ne.s32.totalorder %s1526_s28, %s1522_s27 }
   0x8   : > { %s1805_s13 = smov (%p35_p0, %s33_s13), 0  ;;  %p244_p5 = scmp.eq.s32.totalorder %s1361_s12, 1 }
   0x9   : > { %p1630_p4 = por %p238_p2, %p237_p1  ;;  %s222_s16 = ssub.s32 %s1538_s9, %s1805_s13 }
   0xa   : > { %p1364_p6 = scmp.ge.s32.totalorder %s1542_s10, 1  ;;  %p225_p7 = scmp.eq.s32.totalorder %s222_s16, 0 }
   0xb   : > { %p1637_p8 = por %p244_p5, %p243_p3  ;;  %p304_p9 = scmp.lt.s32.totalorder %s1542_s10, 3 }
   0xc   : > { %s1643_s18 = scalar_select %p225_p7, %s1530_s29, %s227_s14  }
   0xd   : > { %p305_p10 = pnand %p1364_p6, %p304_p9 }
   0xe   : > { %p351_p11 = scmp.lt.s32.totalorder (!%p305_p10), %s1534_s30, 1 }
   0xf   : > { %308 = sbr.rel (%p305_p10) target bundleno = 505 (0x1f9), region = 52 }
  0x14   : > { %v370_v0 = vld [vmem:[%s1791_s3] sm:$0xff]  ;;  %vm388_vm0 = vcmask 31744   ;;  %v371_v2 = vld [vmem:[%s1791_s3 + $0x8] sm:$0xff]  ;;  %v1544_v3 = vmov 0   ;;  %s352_s23 = scalar_select %p351_p11, %s1534_s30, 1  ;;  %vm395_vm1 = vcmask 1043456  }
  0x15   : > { %v390_v1 = vsel %vm388_vm0, %v370_v0, 0  ;;  %1437 = vset.pattern.permute.xlu0 %v1544_v3  ;;  %1439 = vset.pattern.permute.xlu2 %v1544_v3  ;;  %v372_v5 = vld [vmem:[%s1792_s4] sm:$0xff]  ;;  %v393_v7 = vsel %vm388_vm0, %v371_v2, 0  ;;  %v373_v33 = vld [vmem:[%s1792_s4 + $0x8] sm:$0xff]  ;;  %vm855_vm5 = vcmask 64512  }
  0x16   : > { %v1653_v4 = vand.u32 4294901760, %v390_v1  ;;  %1438 = vset.pattern.permute.xlu1 %v1544_v3  ;;  %s1658_s26 = sshll.u32 %s352_s23, 3  ;;  %376 = vperm.xlu0 %1437, %v372_v5   ;;  %v1670_v10 = vand.u32 4294901760, %v393_v7  ;;  %v1189_v32 = vld [vmem:[%s1795_s7] sm:$0xff]  ;;  %s1380_s23 = sshll.u32 %s1534_s30, 4 }
  0x17   : > { %s358_s14 = scalar_lea.vmem %s1788_s0, %s1658_s26  ;;  %s363_s20 = scalar_lea.vmem %s1789_s1, %s1658_s26  ;;  %1192 = vperm.xlu2 %1439, %v1189_v32   ;;  %v849_v35 = vld [vmem:[%s1794_s6] sm:$0xff] }
  0x18   : > { %v1661_v6 = vsub.f32 %v390_v1, %v1653_v4  ;;  %v369_v8 = vld [vmem:[%s358_s14] sm:$0xff]  ;;  %v426_v12 = vsub.f32 %v393_v7, %v1670_v10  ;;  %s367_s25 = scalar_lea.vmem %s1790_s2, %s1658_s26  ;;  %s1255_s11 = scalar_lea.hbm %s1796_s8, %s1380_s23 }
  0x19   : > { %385 = vst [vmem:[#allocation1] ss:$2 sm:$0xff] %v369_v8  ;;  %v792_v13 = vld [vmem:[%s363_s20] sm:$0xff]  ;;  %s347_s20 = sand.u32 1, %s1526_s28   ;;  %s1259_s12 = sshll.u32 %s1255_s11, 4  ;;  %s1260_s12 = int_to_ptr.hbm [resolvable:$true] %s1259_s12 }
  0x1a   : > { %v1668_v9 = vand.u32 4294901760, %v1661_v6  ;;  %v427_v18 = vand.u32 4294901760, %v426_v12  ;;  %v800_v34 = vld [vmem:[%s367_s25] sm:$0xff]  ;;  %s1365_s21 = sshll.u32 %s347_s20, 4  ;;  %s1242_s14 = scalar_lea.sflag [#allocation3], %s347_s20 }
  0x1b   : > { %803 = vperm.xlu1 %1438, %v800_v34   ;;  %s1740_s22 = scalar_lea.vmem [#allocation2], %s1365_s21  ;;  %s1478_s16 = sshra.s32 %s1260_s12, 4  ;;  %s1479_s16 = int_to_ptr.hbm [resolvable:$true] %s1478_s16 }
  0x1c   : > { %v420_v11 = vsub.f32 %v1661_v6, %v1668_v9  ;;  %v428_v24 = vsub.f32 %v426_v12, %v427_v18  ;;  %s1257_s30 = sshll.u32 %s1740_s22, 4  ;;  %s1480_s26 = scalar_lea.hbm %s1479_s16, 16  ;;  %s1258_s30 = int_to_ptr.vmem [resolvable:$true] %s1257_s30 }
  0x1d   : > { %p1481_p12 = scmp.ne.s32.totalorder %s1479_s16, %s1480_s26  ;;  %s1484_s23 = scalar_lea.hbm %s1796_s8, 32 }
  0x1e   : > { %795 = vperm.xlu0 %1437, %v792_v13   ;;  %v421_v17 = vand.u32 4294901760, %v420_v11  ;;  %v429_v29 = vand.u32 4294901760, %v428_v24  ;;  %p1485_p1 = scmp.lt.s32.totalorder %s1479_s16, %s1796_s8  ;;  %p1486_p2 = scmp.lt.s32.totalorder %s1484_s23, %s1480_s26 }
  0x1f   : > { %381 = vperm.xlu2 %1439, %v373_v33   ;;  %p1482_p13 = pnand %p1481_p12, %p1630_p4 }
  0x20   : > { %v386_v14 = vld.sshfl [vmem:[#allocation1] sm:$0xff pattern:$0x75316420]  ;;  %v387_v15 = vld.sshfl [vmem:[#allocation1 + $0x8] sm:$0xff pattern:$0x75316420]  ;;  %p1487_p3 = por %p1486_p2, %p1485_p1 }
  0x21   : > { %v396_v16 = vsel %vm395_vm1, %v386_v14, 0  ;;  %v398_v19 = vsel %vm395_vm1, %v387_v15, 0  ;;  %p1483_p0 = pneg %p1482_p13 }
  0x22   : > { %v415_v20 = vand.u32 4294901760, %v396_v16  ;;  %v592_v21 = vand.u32 4294901760, %v398_v19 }
  0x23   : > { %852 = vperm.xlu1 %1438, %v849_v35   ;;  %p1488_p5 = pnand %p1487_p3, %p1483_p0 }
  0x24   : > { %416 = vmatpush.msra.mxu0 %v415_v20  ;;  %v450_v22 = vsub.f32 %v396_v16, %v415_v20  ;;  %509 = vmatpush.msra.mxu3 %v415_v20  ;;  %v627_v23 = vsub.f32 %v398_v19, %v592_v21 }
  0x25   : > { %422 = vmatmul.f32.vlgmr.msra.gmra.mxu0 %v421_v17  ;;  %513 = vmatmul.f32.vlgmr.msra.gmra.mxu3 %v1668_v9 }
  0x26   : > { %481 = vmatpush.msra.mxu2 %v450_v22  ;;  %v451_v25 = vand.u32 4294901760, %v450_v22  ;;  %v628_v26 = vand.u32 4294901760, %v627_v23 }
  0x27   : > { %484 = vmatmul.f32.vlgmr.msra.gmra.mxu2 %v1661_v6 }
  0x28   : > { %v452_v27 = vsub.f32 %v450_v22, %v451_v25  ;;  %593 = vmatpush.msrb.mxu2 %v592_v21  ;;  %541 = vmatpush.msrb.mxu0 %v451_v25  ;;  %v629_v28 = vsub.f32 %v627_v23, %v628_v26 }
  0x2a   : > { %718 = vmatpush.msra.mxu2 %v628_v26  ;;  %658 = vmatpush.msra.mxu0 %v627_v23  ;;  %v453_v30 = vand.u32 4294901760, %v452_v27  ;;  %v630_v31 = vand.u32 4294901760, %v629_v28 }
  0x2c   : > { %454 = vmatpush.msra.mxu1 %v453_v30  ;;  %631 = vmatpush.msrb.mxu3 %v630_v31 }
  0x2d   : > { %430 = vmatmul.f32.gmra.mxu0 %v429_v29  ;;  %456 = vmatmul.f32.vlgmr.msra.gmra.mxu1 %v1653_v4 }
  0x2e   : > { %519 = vmatmul.f32.gmra.mxu3 %v427_v18  ;;  %567 = vmatpush.msrb.mxu1 %v415_v20 }
  0x2f   : > { %489 = vmatmul.f32.gmra.mxu2 %v426_v12  ;;  %744 = vmatpush.msra.mxu3 %v592_v21 }
  0x30   : > { %686 = vmatpush.msra.mxu1 %v592_v21 }
  0x35   : > { %460 = vmatmul.f32.gmra.mxu1 %v1670_v10  ;;  %543 = vmatmul.f32.vlgmr.msrb.gmra.mxu0 %v1653_v4 }
  0x36   : > { %633 = vmatmul.f32.vlgmr.msrb.gmra.mxu3 %v1653_v4 }
  0x37   : > { %599 = vmatmul.f32.vlgmr.msrb.gmra.mxu2 %v421_v17 }
  0x3d   : > { %547 = vmatmul.f32.gmra.mxu0 %v1670_v10  ;;  %569 = vmatmul.f32.vlgmr.msrb.gmra.mxu1 %v1653_v4 }
  0x3e   : > { %637 = vmatmul.f32.gmra.mxu3 %v1670_v10 }
  0x3f   : > { %607 = vmatmul.f32.gmra.mxu2 %v429_v29 }
  0x45   : > { %573 = vmatmul.f32.gmra.mxu1 %v1670_v10  ;;  %661 = vmatmul.f32.vlgmr.msra.gmra.mxu0 %v1661_v6 }
  0x46   : > { %746 = vmatmul.f32.vlgmr.msra.gmra.mxu3 %v1653_v4 }
  0x47   : > { %720 = vmatmul.f32.vlgmr.msra.gmra.mxu2 %v1653_v4 }
  0x4d   : > { %666 = vmatmul.f32.gmra.mxu0 %v426_v12  ;;  %690 = vmatmul.f32.vlgmr.msra.gmra.mxu1 %v1668_v9 }
  0x4e   : > { %750 = vmatmul.f32.gmra.mxu3 %v1670_v10 }
  0x4f   : > { %724 = vmatmul.f32.gmra.mxu2 %v1670_v10 }
  0x55   : > { %696 = vmatmul.f32.gmra.mxu1 %v427_v18 }
  0x71   : > { %v1708_v37 = vpop.permute.xlu2 %1192 }
  0x79   : > { %v382_v44 = vpop.permute.xlu2 %381 }
  0x88   : > { %v377_v38 = vpop.permute.xlu0 %376 }
  0xa2   : > { %v423_v36 = vpop.f32.mrf.mxu0 }
  0xa3   : > { %v424_v42 = vadd.f32 %v423_v36, %v377_v38 }
  0xa8   : > { %v514_v39 = vpop.f32.mrf.mxu3 }
  0xaa   : > { %v431_v40 = vpop.f32.mrf.mxu0  ;;  %v457_v41 = vpop.f32.mrf.mxu1 }
  0xab   : > { %v485_v43 = vpop.f32.mrf.mxu2  ;;  %v458_v45 = vadd.f32 %v457_v41, %v424_v42  ;;  %v432_v46 = vadd.f32 %v431_v40, %v382_v44  ;;  %v796_v40 = vpop.permute.xlu0 %795 }
  0xac   : > { %v804_v41 = vpop.permute.xlu1 %803 }
  0xad   : > { %v486_v50 = vadd.f32 %v485_v43, %v458_v45 }
  0xaf   : > { %v515_v54 = vadd.f32 %v514_v39, %v486_v50 }
  0xb1   : > { %v520_v47 = vpop.f32.mrf.mxu3 }
  0xb2   : > { %v461_v48 = vpop.f32.mrf.mxu1  ;;  %v544_v49 = vpop.f32.mrf.mxu0 }
  0xb3   : > { %v462_v51 = vadd.f32 %v461_v48, %v432_v46  ;;  %v490_v52 = vpop.f32.mrf.mxu2  ;;  %v545_v56 = vadd.f32 %v544_v49, %v515_v54  ;;  %v848_v49 = vld [vmem:[%s1793_s5] sm:$0xff] }
  0xb5   : > { %v491_v53 = vadd.f32 %v490_v52, %v462_v51 }
  0xb7   : > { %v521_v55 = vadd.f32 %v520_v47, %v491_v53  ;;  %v857_v53 = vsel %vm855_vm5, %v848_v49, 0 }
  0xb9   : > { %v634_v57 = vpop.f32.mrf.mxu3 }
  0xba   : > { %v548_v58 = vpop.f32.mrf.mxu0  ;;  %v570_v59 = vpop.f32.mrf.mxu1 }
  0xbb   : > { %v549_v60 = vadd.f32 %v548_v58, %v521_v55  ;;  %v571_v61 = vadd.f32 %v570_v59, %v545_v56  ;;  %v600_v62 = vpop.f32.mrf.mxu2  ;;  %v1717_v56 = vand.u32 4294901760, %v857_v53 }
  0xbc   : > { %v601_v5 = vadd.f32 %v600_v62, %v377_v38 }
  0xbd   : > { %v754_v63 = vmul.f32 %v571_v61, %v571_v61 }
  0xbe   : > { %v635_v13 = vadd.f32 %v634_v57, %v601_v5 }
  0xbf   : > { %v756_v0 = vrot.slane %v754_v63, 4 }
  0xc1   : > { %v757_v1 = vadd.f32 %v756_v0, %v754_v63  ;;  %v638_v3 = vpop.f32.mrf.mxu3 }
  0xc2   : > { %v574_v2 = vpop.f32.mrf.mxu1  ;;  %v662_v10 = vpop.f32.mrf.mxu0 }
  0xc3   : > { %v758_v4 = vrot.slane %v757_v1, 2  ;;  %v1710_v6 = vadd.f32 %v574_v2, %v549_v60  ;;  %v608_v7 = vpop.f32.mrf.mxu2  ;;  %v663_v15 = vadd.f32 %v662_v10, %v635_v13  ;;  %v877_v60 = vsub.f32 %v857_v53, %v1717_v56 }
  0xc4   : > { %v609_v8 = vadd.f32 %v608_v7, %v382_v44 }
  0xc5   : > { %v759_v9 = vadd.f32 %v758_v4, %v757_v1  ;;  %v878_v2 = vand.u32 4294901760, %v877_v60 }
  0xc6   : > { %v1712_v11 = vadd.f32 %v638_v3, %v609_v8 }
  0xc7   : > { %v760_v12 = vrot.slane %v759_v9, 1  ;;  %v879_v8 = vsub.f32 %v877_v60, %v878_v2 }
  0xc9   : > { %v761_v14 = vadd.f32 %v760_v12, %v759_v9  ;;  %v747_v20 = vpop.f32.mrf.mxu3 }
  0xca   : > { %v691_v16 = vpop.f32.mrf.mxu1 }
  0xcb   : > { %v768_v17 = vmax.f32 %v761_v14, 1e-24  ;;  %v692_v18 = vadd.f32 %v691_v16, %v663_v15  ;;  %v721_v19 = vpop.f32.mrf.mxu2  ;;  %v880_v15 = vand.u32 4294901760, %v879_v8 }
  0xcd   : > { %1440 = vrsqrt.f32 %v768_v17  ;;  %v722_v21 = vadd.f32 %v721_v19, %v692_v18  ;;  %vm776_vm3 = vweird.f32 %v768_v17 }
  0xcf   : > { %v748_v22 = vadd.f32 %v747_v20, %v722_v21 }
  0xd1   : > { %v755_v23 = vmul.f32 %v748_v22, %v748_v22 }
  0xd3   : > { %v1441_v24 = vpop.eup %1440  ;;  %v762_v25 = vrot.slane %v755_v23, 4 }
  0xd4   : > { %v771_v26 = vmul.f32 %v1441_v24, %v768_v17  ;;  %vm777_vm2 = vweird.f32 %v1441_v24 }
  0xd5   : > { %v763_v27 = vadd.f32 %v762_v25, %v755_v23  ;;  %vm778_vm4 = vmor %vm776_vm3, %vm777_vm2 }
  0xd6   : > { %v772_v28 = vmul.f32 %v1441_v24, %v771_v26 }
  0xd7   : > { %v764_v29 = vrot.slane %v763_v27, 2 }
  0xd8   : > { %v773_v30 = vmul.f32 0.5, %v772_v28 }
  0xd9   : > { %v765_v31 = vadd.f32 %v764_v29, %v763_v27 }
  0xda   : > { %v774_v32 = vsub.f32 1.5, %v773_v30 }
  0xdb   : > { %v766_v33 = vrot.slane %v765_v31, 1 }
  0xdc   : > { %v775_v34 = vmul.f32 %v1441_v24, %v774_v32 }
  0xdd   : > { %v767_v35 = vadd.f32 %v766_v33, %v765_v31 }
  0xde   : > { %v779_v36 = vsel %vm778_vm4, %v1441_v24, %v775_v34 }
  0xdf   : > { %v790_v38 = vmul.f32 %v779_v36, %v571_v61  ;;  %v769_v39 = vmax.f32 %v767_v35, 1e-24 }
  0xe1   : > { %1442 = vrsqrt.f32 %v769_v39  ;;  %v798_v42 = vmul.f32 %v796_v40, %v790_v38  ;;  %vm786_vm7 = vweird.f32 %v769_v39  ;;  %v1726_v38 = vpop.f32.mrf.mxu0 }
  0xe3   : > { %v806_v43 = vadd.f32 %v804_v41, %v798_v42 }
  0xe5   : > { %v1370_v44 = vmul.f32 -1.442695, %v806_v43 }
  0xe7   : > { %v1443_v45 = vpop.eup %1442  ;;  %1444 = vpow2.f32 %v1370_v44 }
  0xe8   : > { %v781_v46 = vmul.f32 %v1443_v45, %v769_v39  ;;  %vm787_vm6 = vweird.f32 %v1443_v45  ;;  %v1728_v39 = vpop.f32.mrf.mxu1 }
  0xe9   : > { %vm788_vm8 = vmor %vm786_vm7, %vm787_vm6 }
  0xea   : > { %v782_v47 = vmul.f32 %v1443_v45, %v781_v46 }
  0xec   : > { %v783_v48 = vmul.f32 0.5, %v782_v47 }
  0xed   : > { %v1445_v50 = vpop.eup %1444 }
  0xee   : > { %v784_v51 = vsub.f32 1.5, %v783_v48  ;;  %v814_v52 = vadd.f32 1.0, %v1445_v50 }
  0xf0   : > { %v785_v54 = vmul.f32 %v1443_v45, %v784_v51  ;;  %1446 = vrcp.f32 %v814_v52  ;;  %v827_v1 = vand.u32 2147483648, %v814_v52  ;;  %v825_v4 = vand.u32 2147483647, %v814_v52 }
  0xf1   : > { %vm821_vm10 = vweird.f32 %v814_v52 }
  0xf2   : > { %v789_v55 = vsel %vm788_vm8, %v1443_v45, %v785_v54  ;;  %v828_v7 = vor.u32 1.1754944e-38, %v827_v1  ;;  %vm826_vm12 = vcmp.eq.f32.partialorder %v825_v4, 8.507059e+37 }
  0xf3   : > { %v791_v57 = vmul.f32 %v789_v55, %v748_v22 }
  0xf5   : > { %v799_v58 = vmul.f32 %v796_v40, %v791_v57  ;;  %v1730_v40 = vpop.f32.mrf.mxu2 }
  0xf6   : > { %v1447_v59 = vpop.eup %1446 }
  0xf7   : > { %v807_v61 = vadd.f32 %v804_v41, %v799_v58  ;;  %v817_v62 = vmul.f32 %v1447_v59, %v814_v52  ;;  %vm822_vm9 = vweird.f32 %v1447_v59  ;;  %v1732_v41 = vpop.f32.mrf.mxu3 }
  0xf8   : > { %vm823_vm11 = vmor %vm821_vm10, %vm822_vm9 }
  0xf9   : > { %v1371_v63 = vmul.f32 -1.442695, %v807_v61  ;;  %v818_v0 = vsub.f32 1.0, %v817_v62 }
  0xfb   : > { %1448 = vpow2.f32 %v1371_v63  ;;  %v819_v3 = vmul.f32 %v1447_v59, %v818_v0 }
  0xfd   : > { %v820_v5 = vadd.f32 %v1447_v59, %v819_v3 }
  0xff   : > { %v824_v9 = vsel %vm823_vm11, %v1447_v59, %v820_v5 }
 0x100   : > { %v829_v10 = vsel %vm826_vm12, %v828_v7, %v824_v9 }
 0x101   : > { %v1449_v12 = vpop.eup %1448  ;;  %v846_v13 = vmul.f32 %v829_v10, %v806_v43  ;;  %v853_v43 = vpop.permute.xlu1 %852 }
 0x102   : > { %v815_v14 = vadd.f32 1.0, %v1449_v12 }
 0x103   : > { %v874_v16 = vand.u32 4294901760, %v846_v13 }
 0x104   : > { %1450 = vrcp.f32 %v815_v14  ;;  %v842_v24 = vand.u32 2147483648, %v815_v14  ;;  %v840_v26 = vand.u32 2147483647, %v815_v14  ;;  %vm836_vm14 = vweird.f32 %v815_v14 }
 0x105   : > { %v901_v17 = vsub.f32 %v846_v13, %v874_v16  ;;  %875 = vmatpush.msrb.mxu0 %v874_v16  ;;  %951 = vmatpush.msrb.mxu3 %v874_v16 }
 0x106   : > { %881 = vmatmul.f32.vlgmr.msrb.gmra.mxu0 %v880_v15  ;;  %955 = vmatmul.f32.vlgmr.msrb.gmra.mxu3 %v878_v2  ;;  %v843_v28 = vor.u32 1.1754944e-38, %v842_v24  ;;  %vm841_vm0 = vcmp.eq.f32.partialorder %v840_v26, 8.507059e+37 }
 0x107   : > { %928 = vmatpush.msrb.mxu2 %v901_v17  ;;  %v902_v18 = vand.u32 4294901760, %v901_v17 }
 0x108   : > { %931 = vmatmul.f32.vlgmr.msrb.gmra.mxu2 %v877_v60 }
 0x109   : > { %977 = vmatpush.msra.mxu0 %v902_v18  ;;  %v903_v19 = vsub.f32 %v901_v17, %v902_v18 }
 0x10a   : > { %v1451_v20 = vpop.eup %1450 }
 0x10b   : > { %v832_v21 = vmul.f32 %v1451_v20, %v815_v14  ;;  %v904_v22 = vand.u32 4294901760, %v903_v19  ;;  %vm837_vm13 = vweird.f32 %v1451_v20 }
 0x10c   : > { %vm838_vm15 = vmor %vm836_vm14, %vm837_vm13 }
 0x10d   : > { %v833_v23 = vsub.f32 1.0, %v832_v21  ;;  %905 = vmatpush.msrb.mxu1 %v904_v22 }
 0x10e   : > { %907 = vmatmul.f32.vlgmr.msrb.gmra.mxu1 %v1717_v56  ;;  %979 = vmatmul.f32.vlgmr.msra.gmra.mxu0 %v1717_v56 }
 0x10f   : > { %v834_v25 = vmul.f32 %v1451_v20, %v833_v23  ;;  %999 = vmatpush.msra.mxu1 %v874_v16 }
 0x111   : > { %v835_v27 = vadd.f32 %v1451_v20, %v834_v25 }
 0x113   : > { %v839_v29 = vsel %vm838_vm15, %v1451_v20, %v835_v27 }
 0x114   : > { %v844_v30 = vsel %vm841_vm0, %v843_v28, %v839_v29 }
 0x115   : > { %v847_v31 = vmul.f32 %v844_v30, %v807_v61 }
 0x116   : > { %1001 = vmatmul.f32.vlgmr.msra.gmra.mxu1 %v1717_v56 }
 0x117   : > { %v1020_v32 = vand.u32 4294901760, %v847_v31 }
 0x119   : > { %v1047_v33 = vsub.f32 %v847_v31, %v1020_v32  ;;  %1021 = vmatpush.msra.mxu2 %v1020_v32  ;;  %1097 = vmatpush.msrb.mxu1 %v1020_v32 }
 0x11a   : > { %1027 = vmatmul.f32.vlgmr.msra.gmra.mxu2 %v880_v15 }
 0x11b   : > { %1074 = vmatpush.msrb.mxu0 %v1047_v33  ;;  %v1048_v34 = vand.u32 4294901760, %v1047_v33 }
 0x11c   : > { %1077 = vmatmul.f32.vlgmr.msrb.gmra.mxu0 %v877_v60 }
 0x11d   : > { %1123 = vmatpush.msrb.mxu2 %v1048_v34  ;;  %v1049_v35 = vsub.f32 %v1047_v33, %v1048_v34 }
 0x11e   : > { %1101 = vmatmul.f32.vlgmr.msrb.gmra.mxu1 %v878_v2 }
 0x11f   : > { %v1050_v36 = vand.u32 4294901760, %v1049_v35 }
 0x121   : > { %1051 = vmatpush.msra.mxu3 %v1050_v36 }
 0x122   : > { %1053 = vmatmul.f32.vlgmr.msra.gmra.mxu3 %v1717_v56  ;;  %1125 = vmatmul.f32.vlgmr.msrb.gmra.mxu2 %v1717_v56 }
 0x123   : > { %1145 = vmatpush.msrb.mxu3 %v1020_v32 }
 0x12a   : > { %1147 = vmatmul.f32.vlgmr.msrb.gmra.mxu3 %v1717_v56 }
 0x183   : > { %v882_v42 = vpop.f32.mrf.mxu0 }
 0x184   : > { %v883_v44 = vadd.f32 %v882_v42, %v853_v43 }
 0x189   : > { %v956_v48 = vpop.f32.mrf.mxu3 }
 0x18b   : > { %v908_v45 = vpop.f32.mrf.mxu1  ;;  %v932_v46 = vpop.f32.mrf.mxu2 }
 0x18c   : > { %v909_v47 = vadd.f32 %v908_v45, %v883_v44  ;;  %v980_v50 = vpop.f32.mrf.mxu0 }
 0x18e   : > { %v933_v49 = vadd.f32 %v932_v46, %v909_v47 }
 0x190   : > { %v957_v51 = vadd.f32 %v956_v48, %v933_v49 }
 0x192   : > { %v981_v52 = vadd.f32 %v980_v50, %v957_v51 }
 0x193   : > { %v1002_v53 = vpop.f32.mrf.mxu1 }
 0x194   : > { %v1003_v54 = vadd.f32 %v1002_v53, %v981_v52 }
 0x196   : > { %v1151_v55 = vmul.f32 %v1003_v54, %v1003_v54 }
 0x198   : > { %v1153_v56 = vrot.slane %v1151_v55, 4 }
 0x199   : > { %v1078_v2 = vpop.f32.mrf.mxu0 }
 0x19a   : > { %v1154_v57 = vadd.f32 %v1153_v56, %v1151_v55 }
 0x19b   : > { %v1102_v4 = vpop.f32.mrf.mxu1 }
 0x19c   : > { %v1155_v58 = vrot.slane %v1154_v57, 2 }
 0x19d   : > { %v1028_v61 = vpop.f32.mrf.mxu2 }
 0x19e   : > { %v1156_v59 = vadd.f32 %v1155_v58, %v1154_v57  ;;  %v1029_v0 = vadd.f32 %v1028_v61, %v853_v43 }
 0x1a0   : > { %v1157_v60 = vrot.slane %v1156_v59, 1 }
 0x1a2   : > { %v1158_v62 = vadd.f32 %v1157_v60, %v1156_v59 }
 0x1a4   : > { %v1165_v63 = vmax.f32 %v1158_v62, 1e-24 }
 0x1a5   : > { %v1054_v1 = vpop.f32.mrf.mxu3  ;;  %v1126_v7 = vpop.f32.mrf.mxu2 }
 0x1a6   : > { %1452 = vrsqrt.f32 %v1165_v63  ;;  %v1055_v3 = vadd.f32 %v1054_v1, %v1029_v0  ;;  %vm1173_vm2 = vweird.f32 %v1165_v63 }
 0x1a8   : > { %v1079_v5 = vadd.f32 %v1078_v2, %v1055_v3 }
 0x1aa   : > { %v1103_v8 = vadd.f32 %v1102_v4, %v1079_v5 }
 0x1ac   : > { %v1453_v9 = vpop.eup %1452  ;;  %v1127_v10 = vadd.f32 %v1126_v7, %v1103_v8 }
 0x1ad   : > { %v1168_v12 = vmul.f32 %v1453_v9, %v1165_v63  ;;  %v1148_v13 = vpop.f32.mrf.mxu3  ;;  %vm1174_vm1 = vweird.f32 %v1453_v9 }
 0x1ae   : > { %v1149_v14 = vadd.f32 %v1148_v13, %v1127_v10  ;;  %vm1175_vm3 = vmor %vm1173_vm2, %vm1174_vm1 }
 0x1af   : > { %v1169_v15 = vmul.f32 %v1453_v9, %v1168_v12 }
 0x1b0   : > { %v1152_v16 = vmul.f32 %v1149_v14, %v1149_v14 }
 0x1b1   : > { %v1170_v17 = vmul.f32 0.5, %v1169_v15 }
 0x1b2   : > { %v1159_v18 = vrot.slane %v1152_v16, 4 }
 0x1b3   : > { %v1171_v19 = vsub.f32 1.5, %v1170_v17 }
 0x1b4   : > { %v1160_v20 = vadd.f32 %v1159_v18, %v1152_v16 }
 0x1b5   : > { %v1172_v21 = vmul.f32 %v1453_v9, %v1171_v19 }
 0x1b6   : > { %v1161_v22 = vrot.slane %v1160_v20, 2 }
 0x1b7   : > { %v1176_v23 = vsel %vm1175_vm3, %v1453_v9, %v1172_v21 }
 0x1b8   : > { %v1187_v24 = vmul.f32 %v1176_v23, %v1003_v54  ;;  %v1162_v25 = vadd.f32 %v1161_v22, %v1160_v20 }
 0x1ba   : > { %v1195_v26 = vmul.f32 %v1708_v37, %v1187_v24  ;;  %v1163_v27 = vrot.slane %v1162_v25, 1 }
 0x1bc   : > { %v1372_v28 = vmul.f32 -1.442695, %v1195_v26  ;;  %v1164_v29 = vadd.f32 %v1163_v27, %v1162_v25 }
 0x1be   : > { %1454 = vpow2.f32 %v1372_v28  ;;  %v1166_v30 = vmax.f32 %v1164_v29, 1e-24 }
 0x1c0   : > { %1456 = vrsqrt.f32 %v1166_v30  ;;  %vm1183_vm5 = vweird.f32 %v1166_v30 }
 0x1c4   : > { %v1455_v31 = vpop.eup %1454 }
 0x1c5   : > { %v1203_v32 = vadd.f32 1.0, %v1455_v31 }
 0x1c6   : > { %v1457_v33 = vpop.eup %1456 }
 0x1c7   : > { %1458 = vrcp.f32 %v1203_v32  ;;  %v1178_v34 = vmul.f32 %v1457_v33, %v1166_v30  ;;  %vm1184_vm4 = vweird.f32 %v1457_v33  ;;  %v1216_v47 = vand.u32 2147483648, %v1203_v32 }
 0x1c8   : > { %vm1185_vm6 = vmor %vm1183_vm5, %vm1184_vm4  ;;  %v1214_v49 = vand.u32 2147483647, %v1203_v32  ;;  %vm1210_vm8 = vweird.f32 %v1203_v32 }
 0x1c9   : > { %v1179_v35 = vmul.f32 %v1457_v33, %v1178_v34  ;;  %v1217_v53 = vor.u32 1.1754944e-38, %v1216_v47 }
 0x1ca   : > { %vm1215_vm10 = vcmp.eq.f32.partialorder %v1214_v49, 8.507059e+37 }
 0x1cb   : > { %v1180_v36 = vmul.f32 0.5, %v1179_v35 }
 0x1cd   : > { %v1459_v42 = vpop.eup %1458  ;;  %v1181_v44 = vsub.f32 1.5, %v1180_v36 }
 0x1ce   : > { %v1206_v43 = vmul.f32 %v1459_v42, %v1203_v32  ;;  %vm1211_vm7 = vweird.f32 %v1459_v42 }
 0x1cf   : > { %v1182_v46 = vmul.f32 %v1457_v33, %v1181_v44  ;;  %vm1212_vm9 = vmor %vm1210_vm8, %vm1211_vm7 }
 0x1d0   : > { %v1207_v45 = vsub.f32 1.0, %v1206_v43 }
 0x1d1   : > { %v1186_v50 = vsel %vm1185_vm6, %v1457_v33, %v1182_v46 }
 0x1d2   : > { %v1208_v48 = vmul.f32 %v1459_v42, %v1207_v45  ;;  %v1188_v51 = vmul.f32 %v1186_v50, %v1149_v14 }
 0x1d4   : > { %v1209_v52 = vadd.f32 %v1459_v42, %v1208_v48  ;;  %v1196_v54 = vmul.f32 %v1708_v37, %v1188_v51  ;;  %v668_v37 = vadd.f32 %v1726_v38, %v1712_v11 }
 0x1d6   : > { %v1213_v55 = vsel %vm1212_vm9, %v1459_v42, %v1209_v52  ;;  %v1373_v57 = vmul.f32 -1.442695, %v1196_v54  ;;  %v698_v0 = vadd.f32 %v1728_v39, %v668_v37 }
 0x1d7   : > { %v1218_v56 = vsel %vm1215_vm10, %v1217_v53, %v1213_v55 }
 0x1d8   : > { %v1235_v58 = vmul.f32 %v1218_v56, %v1195_v26  ;;  %1460 = vpow2.f32 %v1373_v57  ;;  %v726_v4 = vadd.f32 %v1730_v40, %v698_v0 }
 0x1da   : > { %v1237_v59 = vadd.f32 %v1235_v58, %v1710_v6  ;;  %v752_v7 = vadd.f32 %v1732_v41, %v726_v4 }
 0x1dc   : > { %1239 = vst [vmem:[%s1740_s22] sm:$0xff] %v1237_v59 }
 0x1de   : > { %v1461_v60 = vpop.eup %1460 }
 0x1df   : > { %v1204_v61 = vadd.f32 1.0, %v1461_v60 }
 0x1e1   : > { %1462 = vrcp.f32 %v1204_v61  ;;  %v1231_v2 = vand.u32 2147483648, %v1204_v61  ;;  %v1229_v6 = vand.u32 2147483647, %v1204_v61  ;;  %vm1225_vm12 = vweird.f32 %v1204_v61 }
 0x1e3   : > { %v1232_v11 = vor.u32 1.1754944e-38, %v1231_v2  ;;  %vm1230_vm14 = vcmp.eq.f32.partialorder %v1229_v6, 8.507059e+37 }
 0x1e7   : > { %v1463_v62 = vpop.eup %1462 }
 0x1e8   : > { %v1221_v63 = vmul.f32 %v1463_v62, %v1204_v61  ;;  %vm1226_vm11 = vweird.f32 %v1463_v62 }
 0x1e9   : > { %vm1227_vm13 = vmor %vm1225_vm12, %vm1226_vm11 }
 0x1ea   : > { %v1222_v1 = vsub.f32 1.0, %v1221_v63 }
 0x1ec   : > { %v1223_v3 = vmul.f32 %v1463_v62, %v1222_v1 }
 0x1ee   : > { %v1224_v5 = vadd.f32 %v1463_v62, %v1223_v3 }
 0x1f0   : > { %v1228_v38 = vsel %vm1227_vm13, %v1463_v62, %v1224_v5 }
 0x1f1   : > { %v1233_v39 = vsel %vm1230_vm14, %v1232_v11, %v1228_v38 }
 0x1f2   : > { %v1236_v8 = vmul.f32 %v1233_v39, %v1196_v54 }
 0x1f4   : > { %v1238_v40 = vadd.f32 %v1236_v8, %v752_v7 }
 0x1f6   : > { %1240 = vst [vmem:[%s1740_s22 + $0x8] sm:$0xff] %v1238_v40 }
 0x1f7   : > { %1491 = shalt.err (!%p1488_p5)
}
 0x1f8   : > { %1381 = dma.vmem_to_hbm [thread:$0]  (%p1630_p4), %s1258_s30, 256, %s1260_s12, %s1242_s14  }
 0x1f9 PF: > { %p1387_p6 = scmp.ge.s32.totalorder %s1542_s10, 2  ;;  %s1271_s20 = sand.u32 1, %s1522_s27  }
 0x1fa   : > { %s1272_s22 = scalar_lea.sflag [#allocation3], %s1271_s20 }
 0x1fb   : > { %p1384_p7 = pnand %p1387_p6, %p1637_p8 }
 0x1fd   : > { %p1385_p9 = pneg %p1384_p7 }
 0x1ff   : > { %1517 = dma.done.wait (%p1385_p9), %s1272_s22, 256  }
 0x200   : > { %1519 = vsyncadd (%p1385_p9), %s1272_s22, 4294967040  ;;  %s21_s10 = sadd.s32 1, %s1542_s10   ;;  %s1799_s27 = smov %s1526_s28 }
 0x201   : > { %p18_p10 = scmp.ge.s32.totalorder %s21_s10, 4   ;;  %s1800_s28 = smov %s1530_s29 }
 0x202   : > { %s1801_s29 = smov %s1643_s18  ;;  %s1802_s30 = smov %s1538_s9 }
 0x203   : > { %s1803_s9 = smov %s1805_s13  ;;  %20 = sbr.rel (!%p18_p10) target bundleno = 4 (0x4), region = 93 }
 0x208   :  { %1278 = vsyncpa [#allocation3], 1 }
 0x209   :  { %1280 = vsyncpa [#allocation3 + $0x1], 1 }

</bundles_post_ra>
